<compile_context>
chip_gen: v7x
topology: tpu7x:2x2x1
jax: 0.10.0
libtpu: 0.0.40
codegen_flags: <defaults>
</compile_context>

<pallas_src>
import jax
import jax.numpy as jnp
from jax import lax
from jax.experimental import pallas as pl
from jax.experimental.pallas import tpu as pltpu


def _bilstm_kernel(x_ref, wih_ref, whh_ref, b_ref, out_ref):
    """Fused bidirectional LSTM recurrence.

    x_ref  : (T*B, D)   f32   row block t = x[t]
    wih_ref: (D, 8H)    f32   dense input weights, gate-major/dir-minor columns,
                              sigmoid-gate (i/f/o) columns pre-scaled by 0.5
    whh_ref: (2H, 8H)   bf16  block-diagonal hidden weights, same layout / pre-scale
    b_ref  : (1, 8H)    f32   folded (b_ih + b_hh) biases, same layout / pre-scale
    out_ref: (T, B, 2H)       forward hidden in [..., :H], backward in [..., H:]
    """
    T, B, H2 = out_ref.shape          # H2 = 2H
    H = H2 // 2
    H8 = wih_ref.shape[1]             # 8H

    # ---- hoisted, lane-dense input projection (+ bias fold): one MXU matmul ----
    # Row block t holds BOTH directions' input gate pre-activations for x[t];
    # per step, fwd lanes use block t and bwd lanes use block T-1-t.
    xg = jnp.dot(x_ref[...], wih_ref[...],
                 preferred_element_type=jnp.float32) + b_ref[...]      # (T*B, 8H) f32

    whh = whh_ref[...]                                                 # bf16 (2H, 8H)

    # Hoisted per-lane constants.
    lane = lax.broadcasted_iota(jnp.int32, (B, H8), 1)
    is_fwd_lane = (lane % H2) < H                       # dir-minor H-wide stripes
    is_g_lane = (lane >= 2 * H2) & (lane < 3 * H2)      # g-gate lanes -> pure tanh
    post_scale = jnp.where(is_g_lane, 1.0, 0.5)         # sigmoid(x) = 0.5*tanh(x/2)+0.5
    post_bias = jnp.where(is_g_lane, 0.0, 0.5)
    out_lane = lax.broadcasted_iota(jnp.int32, (B, H2), 1)
    out_is_fwd = out_lane < H

    h = jnp.zeros((B, H2), jnp.float32)   # [h_fwd | h_bwd]
    c = jnp.zeros((B, H2), jnp.float32)   # [c_fwd | c_bwd]

    # Fully unrolled recurrence (T is small & static).
    hs = []
    for t in range(T):
        xg_t = jnp.where(is_fwd_lane,
                         xg[t * B:(t + 1) * B, :],
                         xg[(T - 1 - t) * B:(T - t) * B, :])           # (B, 8H)
        # Single-pass bf16 MXU matmul on the serial chain; f32 accumulate & state.
        g = xg_t + jnp.dot(h.astype(jnp.bfloat16), whh,
                           preferred_element_type=jnp.float32)         # (B, 8H) f32
        # ONE transcendental for all four gates (pre-scale already folded in weights).
        act = jnp.tanh(g) * post_scale + post_bias
        i_g = act[:, 0 * H2:1 * H2]
        f_g = act[:, 1 * H2:2 * H2]
        g_g = act[:, 2 * H2:3 * H2]
        o_g = act[:, 3 * H2:4 * H2]
        c = f_g * c + i_g * g_g
        h = o_g * jnp.tanh(c)
        hs.append(h)

    # Deferred writeback: stores happen after the recurrence so the vector-store slot
    # stays clear during the serial chain (matters most on v5e's single vst slot).
    # out[t, :, :H] = fwd hidden at time t ; out[t, :, H:] = bwd hidden at time t
    # (produced at fused step T-1-t).
    for t in range(T):
        row = jnp.where(out_is_fwd, hs[t], hs[T - 1 - t])
        out_ref[t] = row.astype(out_ref.dtype)


def pack_bilstm_params(params):
    """Precompute packed kernel weights ONCE (depends only on params, not on x).

    Returns dict with:
      wih: (D, 8H)  f32   dense input weights, gate-major/dir-minor, sigmoid lanes *0.5
      whh: (2H, 8H) bf16  block-diagonal hidden weights, same layout / pre-scale
      b  : (1, 8H)  f32   folded biases, same layout / pre-scale
    """
    H = params["whh_f"].shape[1]      # weight_hh: (4H, H)
    D = params["wih_f"].shape[1]
    H8 = 8 * H

    def per_gate(w):                  # (4H, in) -> (in, 4, H); PyTorch gate order i,f,g,o
        return w.T.reshape(w.shape[1], 4, H)

    # Fold the sigmoid pre-scale (0.5 on i/f/o gates, 1 on g) into weights and bias so
    # the kernel needs only one tanh + per-lane affine per step.
    gate_scale = jnp.array([0.5, 0.5, 1.0, 0.5], jnp.float32)[:, None, None]   # (4,1,1)

    # Dense input weights: columns = [i_f,i_b, f_f,f_b, g_f,g_b, o_f,o_b], each H wide.
    wih = jnp.stack([per_gate(params["wih_f"]),
                     per_gate(params["wih_b"])], axis=2)          # (D, 4, 2, H)
    wih = (wih * gate_scale).reshape(D, H8).astype(jnp.float32)

    # Block-diagonal hidden weights aligned with the [h_fwd | h_bwd] carry.
    whh = jnp.zeros((2, H, 4, 2, H), jnp.float32)
    whh = whh.at[0, :, :, 0, :].set(per_gate(params["whh_f"]))
    whh = whh.at[1, :, :, 1, :].set(per_gate(params["whh_b"]))
    whh = (whh * gate_scale).reshape(2 * H, H8).astype(jnp.bfloat16)

    b_f = (params["bih_f"] + params["bhh_f"]).reshape(4, H)
    b_b = (params["bih_b"] + params["bhh_b"]).reshape(4, H)
    b = (jnp.stack([b_f, b_b], axis=1) * gate_scale).reshape(1, H8).astype(jnp.float32)

    return {"wih": wih, "whh": whh, "b": b}


def bilstm_forward(x, packed):
    """x: (T, B, D) float32.  Returns (T, B, 2H) like PyTorch bidirectional nn.LSTM."""
    T, B, D = x.shape
    H8 = packed["wih"].shape[1]
    H2 = H8 // 4

    x_flat = x.reshape(T * B, D)      # contiguous reshape: free, no extra materialization

    vmem = pl.BlockSpec(memory_space=pltpu.MemorySpace.VMEM)
    # TODO(synk): for large T/H add a T-chunked grid + vmem_limit_bytes guard (v7x: 64 MiB).
    return pl.pallas_call(
        _bilstm_kernel,
        out_shape=jax.ShapeDtypeStruct((T, B, H2), x.dtype),
        in_specs=[vmem, vmem, vmem, vmem],
        out_specs=vmem,
    )(x_flat, packed["wih"], packed["whh"], packed["b"])


# ---------------- pure-JAX reference (for validation) ----------------
def _lstm_ref(x, wih, whh, bih, bhh):
    T, B, D = x.shape
    H = whh.shape[1]

    def step(carry, x_t):
        h, c = carry
        g = x_t @ wih.T + bih + h @ whh.T + bhh
        i = jax.nn.sigmoid(g[:, :H])
        f = jax.nn.sigmoid(g[:, H:2 * H])
        gg = jnp.tanh(g[:, 2 * H:3 * H])
        o = jax.nn.sigmoid(g[:, 3 * H:])
        c = f * c + i * gg
        h = o * jnp.tanh(c)
        return (h, c), h

    init = (jnp.zeros((B, H), jnp.float32), jnp.zeros((B, H), jnp.float32))
    _, hs = lax.scan(step, init, x)
    return hs


def bilstm_ref(x, p):
    out_f = _lstm_ref(x, p["wih_f"], p["whh_f"], p["bih_f"], p["bhh_f"])
    out_b = _lstm_ref(x[::-1], p["wih_b"], p["whh_b"], p["bih_b"], p["bhh_b"])[::-1]
    return jnp.concatenate([out_f, out_b], axis=-1)


def init_params(key, input_dim, hidden):
    """PyTorch nn.LSTM init: uniform(-1/sqrt(H), 1/sqrt(H)) for all params."""
    k = 1.0 / jnp.sqrt(hidden)
    names_shapes = [
        ("wih_f", (4 * hidden, input_dim)), ("whh_f", (4 * hidden, hidden)),
        ("bih_f", (4 * hidden,)), ("bhh_f", (4 * hidden,)),
        ("wih_b", (4 * hidden, input_dim)), ("whh_b", (4 * hidden, hidden)),
        ("bih_b", (4 * hidden,)), ("bhh_b", (4 * hidden,)),
    ]
    keys = jax.random.split(key, len(names_shapes))
    return {name: jax.random.uniform(kk, shape, jnp.float32, -k, k)
            for kk, (name, shape) in zip(keys, names_shapes)}


if __name__ == "__main__":
    # config.input_dim = 16, config.encoder_output_dim = 32 -> hidden = 16 per direction
    T, B, D = 8, 2, 16
    ENCODER_OUTPUT_DIM = 32
    H = ENCODER_OUTPUT_DIM // 2

    root = jax.random.PRNGKey(0)
    kx, kp = jax.random.split(root)
    x = jax.random.normal(kx, (T, B, D), jnp.float32)
    params = init_params(kp, D, H)

    # Packing runs ONCE, outside the jitted per-call hot path.
    packed = jax.tree_util.tree_map(jax.block_until_ready, pack_bilstm_params(params))

    fwd = jax.jit(bilstm_forward)
    out = jax.block_until_ready(fwd(x, packed))
    assert out.shape == (T, B, ENCODER_OUTPUT_DIM), out.shape

    ref = jax.block_until_ready(bilstm_ref(x, params))
    # Tolerance loosened vs the pure-f32 variant: h@Whh uses bf16 operands (f32 accumulate
    # & state), per the performance review; observed error stays well below this bound.
    assert jnp.allclose(out, ref, atol=2e-2, rtol=1e-2), (
        float(jnp.max(jnp.abs(out - ref))))

    print("KERNEL_OK")
</pallas_src>

<mosaic_0001>
module attributes {stable_mosaic.version = 11 : i64} {
  func.func @_bilstm_kernel(%arg0: memref<16x16xf32, #tpu.memory_space<vmem>>, %arg1: memref<16x128xf32, #tpu.memory_space<vmem>>, %arg2: memref<32x128xbf16, #tpu.memory_space<vmem>>, %arg3: memref<1x128xf32, #tpu.memory_space<vmem>>, %arg4: memref<8x2x32xf32, #tpu.memory_space<vmem>>) attributes {dimension_semantics = [], scalar_prefetch = 0 : i64, scratch_operands = 0 : i64, tpu.core_type = #tpu.core_type<tc>} {
    %c0 = arith.constant 0 : index
    %c0_0 = arith.constant 0 : index
    %0 = vector.load %arg0[%c0, %c0_0] : memref<16x16xf32, #tpu.memory_space<vmem>>, vector<16x16xf32>
    %c0_1 = arith.constant 0 : index
    %c0_2 = arith.constant 0 : index
    %1 = vector.load %arg1[%c0_1, %c0_2] : memref<16x128xf32, #tpu.memory_space<vmem>>, vector<16x128xf32>
    %cst = arith.constant dense<0.000000e+00> : vector<16x128xf32>
    %2 = tpu.matmul %0, %1, %cst {dimension_numbers = #tpu.dot_dimension_numbers<[1], [0], [0], [1], [0, 0, 1, 1], [], []>} : vector<16x16xf32>, vector<16x128xf32>, vector<16x128xf32> -> vector<16x128xf32>
    %c0_3 = arith.constant 0 : index
    %c0_4 = arith.constant 0 : index
    %3 = vector.load %arg3[%c0_3, %c0_4] : memref<1x128xf32, #tpu.memory_space<vmem>>, vector<1x128xf32>
    %4 = vector.broadcast %3 : vector<1x128xf32> to vector<16x128xf32>
    %5 = arith.addf %2, %4 : vector<16x128xf32>
    %c0_5 = arith.constant 0 : index
    %c0_6 = arith.constant 0 : index
    %6 = vector.load %arg2[%c0_5, %c0_6] : memref<32x128xbf16, #tpu.memory_space<vmem>>, vector<32x128xbf16>
    %7 = tpu.iota {dimensions = array<i32: 1>} : vector<2x128xi32>
    %c32_i32 = arith.constant 32 : i32
    %c0_i32 = arith.constant 0 : i32
    %8 = arith.cmpi eq, %c32_i32, %c0_i32 : i32
    %c1_i32 = arith.constant 1 : i32
    %9 = arith.select %8, %c1_i32, %c32_i32 : i32
    %10 = vector.broadcast %9 : i32 to vector<2x128xi32>
    %11 = arith.remsi %7, %10 : vector<2x128xi32>
    %c0_i32_7 = arith.constant 0 : i32
    %12 = vector.broadcast %c0_i32_7 : i32 to vector<2x128xi32>
    %13 = arith.cmpi ne, %11, %12 : vector<2x128xi32>
    %c0_i32_8 = arith.constant 0 : i32
    %14 = vector.broadcast %c0_i32_8 : i32 to vector<2x128xi32>
    %15 = arith.cmpi slt, %11, %14 : vector<2x128xi32>
    %c0_i32_9 = arith.constant 0 : i32
    %16 = arith.cmpi slt, %9, %c0_i32_9 : i32
    %17 = vector.broadcast %16 : i1 to vector<2x128xi1>
    %18 = vector.broadcast %17 : vector<2x128xi1> to vector<2x128xi1>
    %19 = arith.xori %15, %18 : vector<2x128xi1>
    %20 = arith.andi %19, %13 : vector<2x128xi1>
    %21 = vector.broadcast %9 : i32 to vector<2x128xi32>
    %22 = arith.addi %11, %21 : vector<2x128xi32>
    %23 = arith.select %20, %22, %11 : vector<2x128xi1>, vector<2x128xi32>
    %c16_i32 = arith.constant 16 : i32
    %24 = vector.broadcast %c16_i32 : i32 to vector<2x128xi32>
    %25 = arith.cmpi slt, %23, %24 : vector<2x128xi32>
    %c64_i32 = arith.constant 64 : i32
    %26 = vector.broadcast %c64_i32 : i32 to vector<2x128xi32>
    %27 = arith.cmpi sge, %7, %26 : vector<2x128xi32>
    %c96_i32 = arith.constant 96 : i32
    %28 = vector.broadcast %c96_i32 : i32 to vector<2x128xi32>
    %29 = arith.cmpi slt, %7, %28 : vector<2x128xi32>
    %30 = arith.andi %27, %29 : vector<2x128xi1>
    %cst_10 = arith.constant 1.000000e+00 : f32
    %cst_11 = arith.constant 5.000000e-01 : f32
    %31 = vector.broadcast %cst_10 : f32 to vector<2x128xf32>
    %32 = vector.broadcast %cst_11 : f32 to vector<2x128xf32>
    %33 = arith.select %30, %31, %32 : vector<2x128xi1>, vector<2x128xf32>
    %cst_12 = arith.constant 0.000000e+00 : f32
    %cst_13 = arith.constant 5.000000e-01 : f32
    %34 = vector.broadcast %cst_12 : f32 to vector<2x128xf32>
    %35 = vector.broadcast %cst_13 : f32 to vector<2x128xf32>
    %36 = arith.select %30, %34, %35 : vector<2x128xi1>, vector<2x128xf32>
    %37 = tpu.iota {dimensions = array<i32: 1>} : vector<2x32xi32>
    %c16_i32_14 = arith.constant 16 : i32
    %38 = vector.broadcast %c16_i32_14 : i32 to vector<2x32xi32>
    %39 = arith.cmpi slt, %37, %38 : vector<2x32xi32>
    %cst_15 = arith.constant 0.000000e+00 : f32
    %40 = vector.broadcast %cst_15 : f32 to vector<2x32xf32>
    %cst_16 = arith.constant 0.000000e+00 : f32
    %41 = vector.broadcast %cst_16 : f32 to vector<2x32xf32>
    %42 = vector.extract_strided_slice %5 {offsets = [0, 0], sizes = [2, 128], strides = [1, 1]} : vector<16x128xf32> to vector<2x128xf32>
    %43 = vector.extract_strided_slice %5 {offsets = [14, 0], sizes = [2, 128], strides = [1, 1]} : vector<16x128xf32> to vector<2x128xf32>
    %44 = arith.select %25, %42, %43 : vector<2x128xi1>, vector<2x128xf32>
    %45 = arith.truncf %40 : vector<2x32xf32> to vector<2x32xbf16>
    %cst_17 = arith.constant dense<0.000000e+00> : vector<2x128xf32>
    %46 = tpu.matmul %45, %6, %cst_17 {dimension_numbers = #tpu.dot_dimension_numbers<[1], [0], [0], [1], [0, 0, 1, 1], [], []>} : vector<2x32xbf16>, vector<32x128xbf16>, vector<2x128xf32> -> vector<2x128xf32>
    %47 = arith.addf %44, %46 : vector<2x128xf32>
    %48 = math.tanh %47 : vector<2x128xf32>
    %49 = arith.mulf %48, %33 : vector<2x128xf32>
    %50 = arith.addf %49, %36 : vector<2x128xf32>
    %51 = vector.extract_strided_slice %50 {offsets = [0, 0], sizes = [2, 32], strides = [1, 1]} : vector<2x128xf32> to vector<2x32xf32>
    %52 = vector.extract_strided_slice %50 {offsets = [0, 32], sizes = [2, 32], strides = [1, 1]} : vector<2x128xf32> to vector<2x32xf32>
    %53 = vector.extract_strided_slice %50 {offsets = [0, 64], sizes = [2, 32], strides = [1, 1]} : vector<2x128xf32> to vector<2x32xf32>
    %54 = vector.extract_strided_slice %50 {offsets = [0, 96], sizes = [2, 32], strides = [1, 1]} : vector<2x128xf32> to vector<2x32xf32>
    %55 = arith.mulf %52, %41 : vector<2x32xf32>
    %56 = arith.mulf %51, %53 : vector<2x32xf32>
    %57 = arith.addf %55, %56 : vector<2x32xf32>
    %58 = math.tanh %57 : vector<2x32xf32>
    %59 = arith.mulf %54, %58 : vector<2x32xf32>
    %60 = vector.extract_strided_slice %5 {offsets = [2, 0], sizes = [2, 128], strides = [1, 1]} : vector<16x128xf32> to vector<2x128xf32>
    %61 = vector.extract_strided_slice %5 {offsets = [12, 0], sizes = [2, 128], strides = [1, 1]} : vector<16x128xf32> to vector<2x128xf32>
    %62 = arith.select %25, %60, %61 : vector<2x128xi1>, vector<2x128xf32>
    %63 = arith.truncf %59 : vector<2x32xf32> to vector<2x32xbf16>
    %cst_18 = arith.constant dense<0.000000e+00> : vector<2x128xf32>
    %64 = tpu.matmul %63, %6, %cst_18 {dimension_numbers = #tpu.dot_dimension_numbers<[1], [0], [0], [1], [0, 0, 1, 1], [], []>} : vector<2x32xbf16>, vector<32x128xbf16>, vector<2x128xf32> -> vector<2x128xf32>
    %65 = arith.addf %62, %64 : vector<2x128xf32>
    %66 = math.tanh %65 : vector<2x128xf32>
    %67 = arith.mulf %66, %33 : vector<2x128xf32>
    %68 = arith.addf %67, %36 : vector<2x128xf32>
    %69 = vector.extract_strided_slice %68 {offsets = [0, 0], sizes = [2, 32], strides = [1, 1]} : vector<2x128xf32> to vector<2x32xf32>
    %70 = vector.extract_strided_slice %68 {offsets = [0, 32], sizes = [2, 32], strides = [1, 1]} : vector<2x128xf32> to vector<2x32xf32>
    %71 = vector.extract_strided_slice %68 {offsets = [0, 64], sizes = [2, 32], strides = [1, 1]} : vector<2x128xf32> to vector<2x32xf32>
    %72 = vector.extract_strided_slice %68 {offsets = [0, 96], sizes = [2, 32], strides = [1, 1]} : vector<2x128xf32> to vector<2x32xf32>
    %73 = arith.mulf %70, %57 : vector<2x32xf32>
    %74 = arith.mulf %69, %71 : vector<2x32xf32>
    %75 = arith.addf %73, %74 : vector<2x32xf32>
    %76 = math.tanh %75 : vector<2x32xf32>
    %77 = arith.mulf %72, %76 : vector<2x32xf32>
    %78 = vector.extract_strided_slice %5 {offsets = [4, 0], sizes = [2, 128], strides = [1, 1]} : vector<16x128xf32> to vector<2x128xf32>
    %79 = vector.extract_strided_slice %5 {offsets = [10, 0], sizes = [2, 128], strides = [1, 1]} : vector<16x128xf32> to vector<2x128xf32>
    %80 = arith.select %25, %78, %79 : vector<2x128xi1>, vector<2x128xf32>
    %81 = arith.truncf %77 : vector<2x32xf32> to vector<2x32xbf16>
    %cst_19 = arith.constant dense<0.000000e+00> : vector<2x128xf32>
    %82 = tpu.matmul %81, %6, %cst_19 {dimension_numbers = #tpu.dot_dimension_numbers<[1], [0], [0], [1], [0, 0, 1, 1], [], []>} : vector<2x32xbf16>, vector<32x128xbf16>, vector<2x128xf32> -> vector<2x128xf32>
    %83 = arith.addf %80, %82 : vector<2x128xf32>
    %84 = math.tanh %83 : vector<2x128xf32>
    %85 = arith.mulf %84, %33 : vector<2x128xf32>
    %86 = arith.addf %85, %36 : vector<2x128xf32>
    %87 = vector.extract_strided_slice %86 {offsets = [0, 0], sizes = [2, 32], strides = [1, 1]} : vector<2x128xf32> to vector<2x32xf32>
    %88 = vector.extract_strided_slice %86 {offsets = [0, 32], sizes = [2, 32], strides = [1, 1]} : vector<2x128xf32> to vector<2x32xf32>
    %89 = vector.extract_strided_slice %86 {offsets = [0, 64], sizes = [2, 32], strides = [1, 1]} : vector<2x128xf32> to vector<2x32xf32>
    %90 = vector.extract_strided_slice %86 {offsets = [0, 96], sizes = [2, 32], strides = [1, 1]} : vector<2x128xf32> to vector<2x32xf32>
    %91 = arith.mulf %88, %75 : vector<2x32xf32>
    %92 = arith.mulf %87, %89 : vector<2x32xf32>
    %93 = arith.addf %91, %92 : vector<2x32xf32>
    %94 = math.tanh %93 : vector<2x32xf32>
    %95 = arith.mulf %90, %94 : vector<2x32xf32>
    %96 = vector.extract_strided_slice %5 {offsets = [6, 0], sizes = [2, 128], strides = [1, 1]} : vector<16x128xf32> to vector<2x128xf32>
    %97 = vector.extract_strided_slice %5 {offsets = [8, 0], sizes = [2, 128], strides = [1, 1]} : vector<16x128xf32> to vector<2x128xf32>
    %98 = arith.select %25, %96, %97 : vector<2x128xi1>, vector<2x128xf32>
    %99 = arith.truncf %95 : vector<2x32xf32> to vector<2x32xbf16>
    %cst_20 = arith.constant dense<0.000000e+00> : vector<2x128xf32>
    %100 = tpu.matmul %99, %6, %cst_20 {dimension_numbers = #tpu.dot_dimension_numbers<[1], [0], [0], [1], [0, 0, 1, 1], [], []>} : vector<2x32xbf16>, vector<32x128xbf16>, vector<2x128xf32> -> vector<2x128xf32>
    %101 = arith.addf %98, %100 : vector<2x128xf32>
    %102 = math.tanh %101 : vector<2x128xf32>
    %103 = arith.mulf %102, %33 : vector<2x128xf32>
    %104 = arith.addf %103, %36 : vector<2x128xf32>
    %105 = vector.extract_strided_slice %104 {offsets = [0, 0], sizes = [2, 32], strides = [1, 1]} : vector<2x128xf32> to vector<2x32xf32>
    %106 = vector.extract_strided_slice %104 {offsets = [0, 32], sizes = [2, 32], strides = [1, 1]} : vector<2x128xf32> to vector<2x32xf32>
    %107 = vector.extract_strided_slice %104 {offsets = [0, 64], sizes = [2, 32], strides = [1, 1]} : vector<2x128xf32> to vector<2x32xf32>
    %108 = vector.extract_strided_slice %104 {offsets = [0, 96], sizes = [2, 32], strides = [1, 1]} : vector<2x128xf32> to vector<2x32xf32>
    %109 = arith.mulf %106, %93 : vector<2x32xf32>
    %110 = arith.mulf %105, %107 : vector<2x32xf32>
    %111 = arith.addf %109, %110 : vector<2x32xf32>
    %112 = math.tanh %111 : vector<2x32xf32>
    %113 = arith.mulf %108, %112 : vector<2x32xf32>
    %114 = vector.extract_strided_slice %5 {offsets = [8, 0], sizes = [2, 128], strides = [1, 1]} : vector<16x128xf32> to vector<2x128xf32>
    %115 = vector.extract_strided_slice %5 {offsets = [6, 0], sizes = [2, 128], strides = [1, 1]} : vector<16x128xf32> to vector<2x128xf32>
    %116 = arith.select %25, %114, %115 : vector<2x128xi1>, vector<2x128xf32>
    %117 = arith.truncf %113 : vector<2x32xf32> to vector<2x32xbf16>
    %cst_21 = arith.constant dense<0.000000e+00> : vector<2x128xf32>
    %118 = tpu.matmul %117, %6, %cst_21 {dimension_numbers = #tpu.dot_dimension_numbers<[1], [0], [0], [1], [0, 0, 1, 1], [], []>} : vector<2x32xbf16>, vector<32x128xbf16>, vector<2x128xf32> -> vector<2x128xf32>
    %119 = arith.addf %116, %118 : vector<2x128xf32>
    %120 = math.tanh %119 : vector<2x128xf32>
    %121 = arith.mulf %120, %33 : vector<2x128xf32>
    %122 = arith.addf %121, %36 : vector<2x128xf32>
    %123 = vector.extract_strided_slice %122 {offsets = [0, 0], sizes = [2, 32], strides = [1, 1]} : vector<2x128xf32> to vector<2x32xf32>
    %124 = vector.extract_strided_slice %122 {offsets = [0, 32], sizes = [2, 32], strides = [1, 1]} : vector<2x128xf32> to vector<2x32xf32>
    %125 = vector.extract_strided_slice %122 {offsets = [0, 64], sizes = [2, 32], strides = [1, 1]} : vector<2x128xf32> to vector<2x32xf32>
    %126 = vector.extract_strided_slice %122 {offsets = [0, 96], sizes = [2, 32], strides = [1, 1]} : vector<2x128xf32> to vector<2x32xf32>
    %127 = arith.mulf %124, %111 : vector<2x32xf32>
    %128 = arith.mulf %123, %125 : vector<2x32xf32>
    %129 = arith.addf %127, %128 : vector<2x32xf32>
    %130 = math.tanh %129 : vector<2x32xf32>
    %131 = arith.mulf %126, %130 : vector<2x32xf32>
    %132 = vector.extract_strided_slice %5 {offsets = [10, 0], sizes = [2, 128], strides = [1, 1]} : vector<16x128xf32> to vector<2x128xf32>
    %133 = vector.extract_strided_slice %5 {offsets = [4, 0], sizes = [2, 128], strides = [1, 1]} : vector<16x128xf32> to vector<2x128xf32>
    %134 = arith.select %25, %132, %133 : vector<2x128xi1>, vector<2x128xf32>
    %135 = arith.truncf %131 : vector<2x32xf32> to vector<2x32xbf16>
    %cst_22 = arith.constant dense<0.000000e+00> : vector<2x128xf32>
    %136 = tpu.matmul %135, %6, %cst_22 {dimension_numbers = #tpu.dot_dimension_numbers<[1], [0], [0], [1], [0, 0, 1, 1], [], []>} : vector<2x32xbf16>, vector<32x128xbf16>, vector<2x128xf32> -> vector<2x128xf32>
    %137 = arith.addf %134, %136 : vector<2x128xf32>
    %138 = math.tanh %137 : vector<2x128xf32>
    %139 = arith.mulf %138, %33 : vector<2x128xf32>
    %140 = arith.addf %139, %36 : vector<2x128xf32>
    %141 = vector.extract_strided_slice %140 {offsets = [0, 0], sizes = [2, 32], strides = [1, 1]} : vector<2x128xf32> to vector<2x32xf32>
    %142 = vector.extract_strided_slice %140 {offsets = [0, 32], sizes = [2, 32], strides = [1, 1]} : vector<2x128xf32> to vector<2x32xf32>
    %143 = vector.extract_strided_slice %140 {offsets = [0, 64], sizes = [2, 32], strides = [1, 1]} : vector<2x128xf32> to vector<2x32xf32>
    %144 = vector.extract_strided_slice %140 {offsets = [0, 96], sizes = [2, 32], strides = [1, 1]} : vector<2x128xf32> to vector<2x32xf32>
    %145 = arith.mulf %142, %129 : vector<2x32xf32>
    %146 = arith.mulf %141, %143 : vector<2x32xf32>
    %147 = arith.addf %145, %146 : vector<2x32xf32>
    %148 = math.tanh %147 : vector<2x32xf32>
    %149 = arith.mulf %144, %148 : vector<2x32xf32>
    %150 = vector.extract_strided_slice %5 {offsets = [12, 0], sizes = [2, 128], strides = [1, 1]} : vector<16x128xf32> to vector<2x128xf32>
    %151 = vector.extract_strided_slice %5 {offsets = [2, 0], sizes = [2, 128], strides = [1, 1]} : vector<16x128xf32> to vector<2x128xf32>
    %152 = arith.select %25, %150, %151 : vector<2x128xi1>, vector<2x128xf32>
    %153 = arith.truncf %149 : vector<2x32xf32> to vector<2x32xbf16>
    %cst_23 = arith.constant dense<0.000000e+00> : vector<2x128xf32>
    %154 = tpu.matmul %153, %6, %cst_23 {dimension_numbers = #tpu.dot_dimension_numbers<[1], [0], [0], [1], [0, 0, 1, 1], [], []>} : vector<2x32xbf16>, vector<32x128xbf16>, vector<2x128xf32> -> vector<2x128xf32>
    %155 = arith.addf %152, %154 : vector<2x128xf32>
    %156 = math.tanh %155 : vector<2x128xf32>
    %157 = arith.mulf %156, %33 : vector<2x128xf32>
    %158 = arith.addf %157, %36 : vector<2x128xf32>
    %159 = vector.extract_strided_slice %158 {offsets = [0, 0], sizes = [2, 32], strides = [1, 1]} : vector<2x128xf32> to vector<2x32xf32>
    %160 = vector.extract_strided_slice %158 {offsets = [0, 32], sizes = [2, 32], strides = [1, 1]} : vector<2x128xf32> to vector<2x32xf32>
    %161 = vector.extract_strided_slice %158 {offsets = [0, 64], sizes = [2, 32], strides = [1, 1]} : vector<2x128xf32> to vector<2x32xf32>
    %162 = vector.extract_strided_slice %158 {offsets = [0, 96], sizes = [2, 32], strides = [1, 1]} : vector<2x128xf32> to vector<2x32xf32>
    %163 = arith.mulf %160, %147 : vector<2x32xf32>
    %164 = arith.mulf %159, %161 : vector<2x32xf32>
    %165 = arith.addf %163, %164 : vector<2x32xf32>
    %166 = math.tanh %165 : vector<2x32xf32>
    %167 = arith.mulf %162, %166 : vector<2x32xf32>
    %168 = vector.extract_strided_slice %5 {offsets = [14, 0], sizes = [2, 128], strides = [1, 1]} : vector<16x128xf32> to vector<2x128xf32>
    %169 = vector.extract_strided_slice %5 {offsets = [0, 0], sizes = [2, 128], strides = [1, 1]} : vector<16x128xf32> to vector<2x128xf32>
    %170 = arith.select %25, %168, %169 : vector<2x128xi1>, vector<2x128xf32>
    %171 = arith.truncf %167 : vector<2x32xf32> to vector<2x32xbf16>
    %cst_24 = arith.constant dense<0.000000e+00> : vector<2x128xf32>
    %172 = tpu.matmul %171, %6, %cst_24 {dimension_numbers = #tpu.dot_dimension_numbers<[1], [0], [0], [1], [0, 0, 1, 1], [], []>} : vector<2x32xbf16>, vector<32x128xbf16>, vector<2x128xf32> -> vector<2x128xf32>
    %173 = arith.addf %170, %172 : vector<2x128xf32>
    %174 = math.tanh %173 : vector<2x128xf32>
    %175 = arith.mulf %174, %33 : vector<2x128xf32>
    %176 = arith.addf %175, %36 : vector<2x128xf32>
    %177 = vector.extract_strided_slice %176 {offsets = [0, 0], sizes = [2, 32], strides = [1, 1]} : vector<2x128xf32> to vector<2x32xf32>
    %178 = vector.extract_strided_slice %176 {offsets = [0, 32], sizes = [2, 32], strides = [1, 1]} : vector<2x128xf32> to vector<2x32xf32>
    %179 = vector.extract_strided_slice %176 {offsets = [0, 64], sizes = [2, 32], strides = [1, 1]} : vector<2x128xf32> to vector<2x32xf32>
    %180 = vector.extract_strided_slice %176 {offsets = [0, 96], sizes = [2, 32], strides = [1, 1]} : vector<2x128xf32> to vector<2x32xf32>
    %181 = arith.mulf %178, %165 : vector<2x32xf32>
    %182 = arith.mulf %177, %179 : vector<2x32xf32>
    %183 = arith.addf %181, %182 : vector<2x32xf32>
    %184 = math.tanh %183 : vector<2x32xf32>
    %185 = arith.mulf %180, %184 : vector<2x32xf32>
    %186 = arith.select %39, %59, %185 : vector<2x32xi1>, vector<2x32xf32>
    %c0_25 = arith.constant 0 : index
    %c0_26 = arith.constant 0 : index
    %c0_27 = arith.constant 0 : index
    %187 = vector.load %arg4[%c0_25, %c0_26, %c0_27] : memref<8x2x32xf32, #tpu.memory_space<vmem>>, vector<1x2x32xf32>
    %188 = vector.shape_cast %187 : vector<1x2x32xf32> to vector<2x32xf32>
    %189 = vector.shape_cast %186 : vector<2x32xf32> to vector<1x2x32xf32>
    tpu.vector_store %arg4[%c0_25, %c0_26, %c0_27], %189 {strides = array<i32>} : memref<8x2x32xf32, #tpu.memory_space<vmem>>, vector<1x2x32xf32>,
    %190 = arith.select %39, %77, %167 : vector<2x32xi1>, vector<2x32xf32>
    %c1 = arith.constant 1 : index
    %c0_28 = arith.constant 0 : index
    %c0_29 = arith.constant 0 : index
    %191 = vector.load %arg4[%c1, %c0_28, %c0_29] : memref<8x2x32xf32, #tpu.memory_space<vmem>>, vector<1x2x32xf32>
    %192 = vector.shape_cast %191 : vector<1x2x32xf32> to vector<2x32xf32>
    %193 = vector.shape_cast %190 : vector<2x32xf32> to vector<1x2x32xf32>
    tpu.vector_store %arg4[%c1, %c0_28, %c0_29], %193 {strides = array<i32>} : memref<8x2x32xf32, #tpu.memory_space<vmem>>, vector<1x2x32xf32>,
    %194 = arith.select %39, %95, %149 : vector<2x32xi1>, vector<2x32xf32>
    %c2 = arith.constant 2 : index
    %c0_30 = arith.constant 0 : index
    %c0_31 = arith.constant 0 : index
    %195 = vector.load %arg4[%c2, %c0_30, %c0_31] : memref<8x2x32xf32, #tpu.memory_space<vmem>>, vector<1x2x32xf32>
    %196 = vector.shape_cast %195 : vector<1x2x32xf32> to vector<2x32xf32>
    %197 = vector.shape_cast %194 : vector<2x32xf32> to vector<1x2x32xf32>
    tpu.vector_store %arg4[%c2, %c0_30, %c0_31], %197 {strides = array<i32>} : memref<8x2x32xf32, #tpu.memory_space<vmem>>, vector<1x2x32xf32>,
    %198 = arith.select %39, %113, %131 : vector<2x32xi1>, vector<2x32xf32>
    %c3 = arith.constant 3 : index
    %c0_32 = arith.constant 0 : index
    %c0_33 = arith.constant 0 : index
    %199 = vector.load %arg4[%c3, %c0_32, %c0_33] : memref<8x2x32xf32, #tpu.memory_space<vmem>>, vector<1x2x32xf32>
    %200 = vector.shape_cast %199 : vector<1x2x32xf32> to vector<2x32xf32>
    %201 = vector.shape_cast %198 : vector<2x32xf32> to vector<1x2x32xf32>
    tpu.vector_store %arg4[%c3, %c0_32, %c0_33], %201 {strides = array<i32>} : memref<8x2x32xf32, #tpu.memory_space<vmem>>, vector<1x2x32xf32>,
    %202 = arith.select %39, %131, %113 : vector<2x32xi1>, vector<2x32xf32>
    %c4 = arith.constant 4 : index
    %c0_34 = arith.constant 0 : index
    %c0_35 = arith.constant 0 : index
    %203 = vector.load %arg4[%c4, %c0_34, %c0_35] : memref<8x2x32xf32, #tpu.memory_space<vmem>>, vector<1x2x32xf32>
    %204 = vector.shape_cast %203 : vector<1x2x32xf32> to vector<2x32xf32>
    %205 = vector.shape_cast %202 : vector<2x32xf32> to vector<1x2x32xf32>
    tpu.vector_store %arg4[%c4, %c0_34, %c0_35], %205 {strides = array<i32>} : memref<8x2x32xf32, #tpu.memory_space<vmem>>, vector<1x2x32xf32>,
    %206 = arith.select %39, %149, %95 : vector<2x32xi1>, vector<2x32xf32>
    %c5 = arith.constant 5 : index
    %c0_36 = arith.constant 0 : index
    %c0_37 = arith.constant 0 : index
    %207 = vector.load %arg4[%c5, %c0_36, %c0_37] : memref<8x2x32xf32, #tpu.memory_space<vmem>>, vector<1x2x32xf32>
    %208 = vector.shape_cast %207 : vector<1x2x32xf32> to vector<2x32xf32>
    %209 = vector.shape_cast %206 : vector<2x32xf32> to vector<1x2x32xf32>
    tpu.vector_store %arg4[%c5, %c0_36, %c0_37], %209 {strides = array<i32>} : memref<8x2x32xf32, #tpu.memory_space<vmem>>, vector<1x2x32xf32>,
    %210 = arith.select %39, %167, %77 : vector<2x32xi1>, vector<2x32xf32>
    %c6 = arith.constant 6 : index
    %c0_38 = arith.constant 0 : index
    %c0_39 = arith.constant 0 : index
    %211 = vector.load %arg4[%c6, %c0_38, %c0_39] : memref<8x2x32xf32, #tpu.memory_space<vmem>>, vector<1x2x32xf32>
    %212 = vector.shape_cast %211 : vector<1x2x32xf32> to vector<2x32xf32>
    %213 = vector.shape_cast %210 : vector<2x32xf32> to vector<1x2x32xf32>
    tpu.vector_store %arg4[%c6, %c0_38, %c0_39], %213 {strides = array<i32>} : memref<8x2x32xf32, #tpu.memory_space<vmem>>, vector<1x2x32xf32>,
    %214 = arith.select %39, %185, %59 : vector<2x32xi1>, vector<2x32xf32>
    %c7 = arith.constant 7 : index
    %c0_40 = arith.constant 0 : index
    %c0_41 = arith.constant 0 : index
    %215 = vector.load %arg4[%c7, %c0_40, %c0_41] : memref<8x2x32xf32, #tpu.memory_space<vmem>>, vector<1x2x32xf32>
    %216 = vector.shape_cast %215 : vector<1x2x32xf32> to vector<2x32xf32>
    %217 = vector.shape_cast %214 : vector<2x32xf32> to vector<1x2x32xf32>
    tpu.vector_store %arg4[%c7, %c0_40, %c0_41], %217 {strides = array<i32>} : memref<8x2x32xf32, #tpu.memory_space<vmem>>, vector<1x2x32xf32>,
    return
  }
}

</mosaic_0001>

<bundles_post_ra>
// kernel: bilstm_forward.1
= control target key start
LH: loop header
LB: loop body
LE: loop exit
PB: predicated region body
PF: predicated region fallthrough
CT: control target
= control target key end

     0   :  { %9 = vsyncpa [#allocation3], 0  ;;  %s1421_s0 = inlined_call_operand.hbm [shape: f32[16,16], index: 0, kind: input, shape index: {}]   ;;  %s1422_s1 = inlined_call_operand.hbm [shape: f32[16,128], index: 1, kind: input, shape index: {}]   ;;  %s1423_s2 = inlined_call_operand.hbm [shape: bf16[32,128], index: 2, kind: input, shape index: {}]   ;;  %s1424_s3 = inlined_call_operand.vmem [shape: f32[1,128], index: 3, kind: input, shape index: {}]   ;;  %s1425_s4 = inlined_call_operand.hbm [shape: f32[8,2,32], index: 4, kind: output, shape index: {}]  }
   0x1   :  { %10 = vsyncpa [#allocation6], 0 }
   0x2   :  { %11 = vsyncpa [#allocation4], 0  ;;  %s1126_s15 = smov [#allocation5]   ;;  %s1127_s17 = smov [#allocation2]  }
   0x3   :  { %s29_s16 = sshll.u32 %s1126_s15, 4  ;;  %s17_s18 = sshll.u32 %s1127_s17, 4  ;;  %s30_s16 = int_to_ptr.vmem [resolvable:$true] %s29_s16  ;;  %s1165_s18 = int_to_ptr.vmem [resolvable:$true] %s17_s18 }
   0x4   :  { %s1032_s21 = scalar_lea.hbm %s1422_s1, 256 }
   0x5   :  { %p1033_p0 = scmp.ne.s32.totalorder %s1422_s1, %s1032_s21  ;;  %p1036_p1 = scmp.lt.u32.totalorder %s1032_s21, %s1422_s1 }
   0x7   :  { %p1038_p2 = pnand %p1036_p1, %p1033_p0 }
   0x9   :  { %1041 = shalt.err (!%p1038_p2)
}
   0xa   :  { %s1042_s26 = scalar_lea.vmem %s30_s16, 256  ;;  %p1047_p4 = scmp.lt.s32.totalorder %s30_s16, %s30_s16 }
   0xb   :  { %p1043_p3 = scmp.ne.s32.totalorder %s30_s16, %s1042_s26  ;;  %p1048_p5 = scmp.lt.s32.totalorder %s1042_s26, %s1042_s26 }
   0xd   :  { %p1049_p6 = por %p1048_p5, %p1047_p4 }
   0xf   :  { %p1050_p7 = pnand %p1049_p6, %p1043_p3 }
  0x11   :  { %1053 = shalt.err (!%p1050_p7)
}
  0x12   :  { %s1128_s27 = smov 128   ;;  %s1129_s28 = smov 8  }
  0x13   :  { %35 = dma.hbm_to_vmem [thread:$0]  %s1422_s1, 256, %s30_s16, [#allocation6], %s1128_s27, %s1128_s27, %s1129_s28  }
  0x14   :  { %s1054_s7 = scalar_lea.hbm %s1421_s0, 256 }
  0x15   :  { %p1055_p8 = scmp.ne.s32.totalorder %s1421_s0, %s1054_s7  ;;  %p1058_p9 = scmp.lt.u32.totalorder %s1054_s7, %s1421_s0 }
  0x17   :  { %p1060_p10 = pnand %p1058_p9, %p1055_p8 }
  0x19   :  { %1063 = shalt.err (!%p1060_p10)
}
  0x1a   :  { %s1064_s12 = scalar_lea.vmem %s1165_s18, 256  ;;  %p1069_p12 = scmp.lt.s32.totalorder %s1165_s18, %s1165_s18 }
  0x1b   :  { %p1065_p11 = scmp.ne.s32.totalorder %s1165_s18, %s1064_s12  ;;  %p1070_p13 = scmp.lt.s32.totalorder %s1064_s12, %s1064_s12 }
  0x1d   :  { %p1071_p0 = por %p1070_p13, %p1069_p12 }
  0x1f   :  { %p1072_p1 = pnand %p1071_p0, %p1065_p11 }
  0x21   :  { %1075 = shalt.err (!%p1072_p1)
}
  0x22   :  { %23 = dma.hbm_to_vmem [thread:$0]  %s1421_s0, 256, %s1165_s18, [#allocation3], %s1128_s27, %s1128_s27, %s1129_s28  }
  0x23   :  { %s1130_s14 = smov [#allocation7]   ;;  %s1076_s19 = scalar_lea.hbm %s1423_s2, 256 }
  0x24   :  { %s41_s15 = sshll.u32 %s1130_s14, 4  ;;  %p1077_p2 = scmp.ne.s32.totalorder %s1423_s2, %s1076_s19  ;;  %s42_s15 = int_to_ptr.vmem [resolvable:$true] %s41_s15 }
  0x25   :  { %p1080_p3 = scmp.lt.u32.totalorder %s1076_s19, %s1423_s2 }
  0x27   :  { %p1082_p4 = pnand %p1080_p3, %p1077_p2 }
  0x29   :  { %1085 = shalt.err (!%p1082_p4)
}
  0x2a   :  { %s1086_s24 = scalar_lea.vmem %s42_s15, 256  ;;  %p1091_p6 = scmp.lt.s32.totalorder %s42_s15, %s42_s15 }
  0x2b   :  { %p1087_p5 = scmp.ne.s32.totalorder %s42_s15, %s1086_s24  ;;  %p1092_p7 = scmp.lt.s32.totalorder %s1086_s24, %s1086_s24 }
  0x2d   :  { %p1093_p8 = por %p1092_p7, %p1091_p6 }
  0x2f   :  { %p1094_p9 = pnand %p1093_p8, %p1087_p5 }
  0x31   :  { %1097 = shalt.err (!%p1094_p9)
}
  0x32   :  { %s1131_s0 = smov 64   ;;  %s1132_s18 = smov 4  }
  0x33   :  { %47 = dma.hbm_to_vmem [thread:$0]  %s1423_s2, 256, %s42_s15, [#allocation6], %s1131_s0, %s1131_s0, %s1132_s18  }
  0x34   :  { %1120 = dma.done.wait [#allocation3], 256  }
  0x35   :  { %1121 = vsyncadd [#allocation3], 4294967040 }
  0x36   :  { %1122 = dma.done.wait [#allocation6], 512  }
  0x37   :  { %1123 = vsyncadd [#allocation6], 4294966784  ;;  %v1133_v0 = vmov 0.0   ;;  %vm1134_vm0 = vmmov 0   ;;  %vm71_vm1 = vcmask 130048   ;;  %v62_v1 = vld [vmem:[#allocation5] sm:$0xff]  ;;  %v157_v9 = vlaneseq }
  0x38   :  { %916 = vmatprep.subr.bf16.mxu1 %v1133_v0  ;;  %920 = vmatprep.mubr.msk.bf16.mxu1 %vm1134_vm0, %v1133_v0  ;;  %v63_v2 = vld [vmem:[#allocation5 + $0x8] sm:$0xff]  ;;  %v1213_v4 = vld [vmem:[#allocation7] sm:$0xff]   ;;  %v1216_v6 = vld [vmem:[#allocation7 + $0x8] sm:$0xff]   ;;  %v1135_v8 = vmov 0   ;;  %v1136_v30 = vmov 0.5   ;;  %vm194_vm6 = vcmask 261120  }
  0x39   :  { %v980_v3 = vpack.c.bf16 %v63_v2, %v62_v1  ;;  %v60_v5 = vld [vmem:[#allocation2] sm:$0xff]  ;;  %917 = vmatpush3.bf16.msra.mxu1 %v1213_v4  ;;  %v61_v7 = vld [vmem:[#allocation2 + $0x8] sm:$0xff]  ;;  %v1234_v10 = vand.u32 127, %v157_v9  ;;  %vm799_vm8 = vcmask 254976   ;;  %s1138_s28 = smov [#allocation8]  }
  0x3a   :  { %913 = vmatprep.mubr.msk.f32.mxu0 %vm71_vm1, %v60_v5  ;;  %918 = vmatprep.subr.bf16.mxu1 %v1133_v0  ;;  %v869_v11 = vld [vmem:[%s1424_s3] ss:$0 sm:$0xff]  ;;  %s1137_s3 = smov 32   ;;  %s856_s29 = sshll.u32 %s1138_s28, 4  ;;  %s857_s29 = int_to_ptr.vmem [resolvable:$true] %s856_s29 }
  0x3b   :  { %981 = vmatprep.subr.bf16.mxu0 %v980_v3  ;;  %v163_v12 = vand.u32 31, %v1234_v10  ;;  %vm172_vm3 = vcmp.ge.s32.totalorder %v1234_v10, 64  ;;  %vm173_vm4 = vcmp.lt.s32.totalorder %v1234_v10, 96  ;;  %vm177_vm7 = vcmp.lt.s32.totalorder %v1234_v10, 16  ;;  %s1098_s30 = scalar_lea.vmem %s857_s29, 256  ;;  %p1103_p11 = scmp.lt.s32.totalorder %s857_s29, %s857_s29 }
  0x3c   :  { %983 = vmatpush3.bf16.msra.mxu0 %v980_v3  ;;  %vm174_vm5 = vmand %vm172_vm3, %vm173_vm4  ;;  %p1099_p10 = scmp.ne.s32.totalorder %s857_s29, %s1098_s30  ;;  %p1104_p12 = scmp.lt.s32.totalorder %s1098_s30, %s1098_s30 }
  0x3d   :  { %924 = vmatprep.subr.bf16.mxu0 %v1133_v0  ;;  %919 = vmatpush3.bf16.msra.mxu1 %v1216_v6  ;;  %vm171_vm2 = vcmp.lt.s32.totalorder %v163_v12, 16  ;;  %v1251_v31 = vsel %vm174_vm5, 1.0, %v1136_v30  ;;  %v1253_v33 = vsel %vm174_vm5, 0.0, %v1136_v30 }
  0x3e   :  { %932 = vmatprep.subr.bf16.mxu1 %v1133_v0  ;;  %p1105_p13 = por %p1104_p12, %p1103_p11 }
  0x3f   :  { %914 = vmatmul.mubr.msk.f32.vlgmr.msra.gmra.mrb[0].mxu0 %vm71_vm1, %v61_v7 }
  0x40   :  { %925 = vmatpush3.bf16.msra.mxu0 %v1213_v4  ;;  %928 = vmatprep.mubr.msk.bf16.mxu0 %vm1134_vm0, %v1133_v0  ;;  %p1106_p0 = pnand %p1105_p13, %p1099_p10 }
  0x41   :  { %926 = vmatprep.subr.bf16.mxu0 %v1133_v0  ;;  %921 = vmatmul.mubr.bf16.vlgmr.msra.gmra.mrb[0].mxu1 %v1135_v8 }
  0x42   :  { %933 = vmatpush3.bf16.msra.mxu1 %v1213_v4  ;;  %936 = vmatprep.mubr.msk.bf16.mxu1 %vm1134_vm0, %v1133_v0 }
  0x43   :  { %934 = vmatprep.subr.bf16.mxu1 %v1133_v0 }
  0x44   :  { %927 = vmatpush3.bf16.msra.mxu0 %v1216_v6 }
  0x45   :  { %940 = vmatprep.subr.bf16.mxu0 %v1133_v0 }
  0x46   :  { %935 = vmatpush3.bf16.msra.mxu1 %v1216_v6 }
  0x47   :  { %948 = vmatprep.subr.bf16.mxu1 %v1133_v0 }
 0x112   :  { %v915_v13 = vpop.f32.mrb[0].mxu0 }
 0x113   :  { %v150_v14 = vadd.f32 %v915_v13, %v869_v11  ;;  %v144_v15 = vpop.f32.mrb[1].mxu0 }
 0x114   :  { %v145_v16 = vadd.f32 %v869_v11, %v144_v15  ;;  %v232_v18 = vpop.f32.mrb[0].mxu1 }
 0x115   :  { %v179_v17 = vrot.slane %v150_v14, 6  ;;  %v259_v19 = vrot.slane %v150_v14, 2  ;;  %v922_v20 = vpop.f32.mrb[1].mxu1 }
 0x116   :  { %v487_v21 = vrot.slane %v145_v16, 6  ;;  %v562_v22 = vrot.slane %v145_v16, 2  ;;  %v235_v24 = vpop.f32.mrb[2].mxu1 }
 0x117   :  { %v1240_v23 = vsel %vm171_vm2, %v145_v16, %v179_v17  ;;  %v1242_v25 = vsel %vm171_vm2, %v145_v16, %v259_v19  ;;  %v923_v27 = vpop.f32.mrb[3].mxu1 }
 0x118   :  { %v238_v26 = vadd.f32 %v232_v18, %v1240_v23  ;;  %v1245_v28 = vsel %vm171_vm2, %v150_v14, %v487_v21  ;;  %v1247_v29 = vsel %vm171_vm2, %v150_v14, %v562_v22 }
 0x11a   :  { %1000 = vtanh.f32 %v238_v26 }
 0x124   :  { %v1001_v32 = vpop.eup %1000 }
 0x125   :  { %v240_v34 = vmul.f32 %v1001_v32, %v1251_v31 }
 0x127   :  { %v241_v35 = vadd.f32 %v240_v34, %v1253_v33 }
 0x129   :  { %244 = vrot.lane.b32.xlu0 %v241_v35, %s1131_s0  ;;  %v242_v38 = vmul.f32 0.0, %v241_v35 }
 0x19b   :  { %v245_v36 = vpop.permute.xlu0 %244 }
 0x19c   :  { %v247_v37 = vmul.f32 %v245_v36, %v241_v35 }
 0x19e   :  { %249 = vrot.lane.b32.xlu0 %v247_v37, %s1137_s3 }
 0x210   :  { %v250_v39 = vpop.permute.xlu0 %249 }
 0x211   :  { %v252_v40 = vadd.f32 %v250_v39, %v242_v38 }
 0x213   :  { %1002 = vtanh.f32 %v252_v40  ;;  %v317_v57 = vrot.slane %v252_v40, 6 }
 0x21d   :  { %v1003_v41 = vpop.eup %1002 }
 0x21e   :  { %255 = vrot.lane.b32.xlu1 %v1003_v41, %s1131_s0 }
 0x290   :  { %v256_v42 = vpop.permute.xlu1 %255 }
 0x291   :  { %v1260_v43 = vmul.f32 %v256_v42, %v241_v35 }
 0x293   :  { %v262_v44 = vpack.c.bf16 %v1260_v43, %v1260_v43 }
 0x295   :  { %264 = vrot.lane.b32.xlu1 %v262_v44, %s1137_s3 }
 0x307   :  { %v265_v45 = vpop.permute.xlu1 %264 }
 0x308   :  { %929 = vmatmul.mubr.msk.bf16.vlgmr.msra.gmra.mrb[4].mxu0 %vm194_vm6, %v265_v45 }
 0x309   :  { %941 = vmatpush3.bf16.msra.mxu0 %v1213_v4  ;;  %944 = vmatprep.mubr.msk.bf16.mxu0 %vm1134_vm0, %v1133_v0 }
 0x30a   :  { %942 = vmatprep.subr.bf16.mxu0 %v1133_v0 }
 0x30d   :  { %943 = vmatpush3.bf16.msra.mxu0 %v1216_v6 }
 0x30e   :  { %956 = vmatprep.subr.bf16.mxu0 %v1133_v0 }
 0x3db   :  { %v303_v46 = vpop.f32.mrb[4].mxu0 }
 0x3dc   :  { %v310_v47 = vrot.slane %v303_v46, 6  ;;  %v930_v48 = vpop.f32.mrb[5].mxu0 }
 0x3dd   :  { %v306_v49 = vpop.f32.mrb[6].mxu0 }
 0x3de   :  { %v312_v50 = vadd.f32 %v310_v47, %v1242_v25  ;;  %v931_v51 = vpop.f32.mrb[7].mxu0 }
 0x3e0   :  { %1004 = vtanh.f32 %v312_v50 }
 0x3ea   :  { %v1005_v52 = vpop.eup %1004 }
 0x3eb   :  { %v314_v53 = vmul.f32 %v1005_v52, %v1251_v31 }
 0x3ed   :  { %v315_v54 = vadd.f32 %v314_v53, %v1253_v33 }
 0x3ef   :  { %321 = vrot.lane.b32.xlu0 %v315_v54, %s1131_s0  ;;  %v319_v58 = vmul.f32 %v317_v57, %v315_v54 }
 0x461   :  { %v322_v55 = vpop.permute.xlu0 %321 }
 0x462   :  { %v324_v56 = vmul.f32 %v322_v55, %v315_v54 }
 0x464   :  { %326 = vrot.lane.b32.xlu1 %v324_v56, %s1137_s3 }
 0x4d6   :  { %v327_v59 = vpop.permute.xlu1 %326 }
 0x4d7   :  { %v329_v60 = vadd.f32 %v327_v59, %v319_v58 }
 0x4d9   :  { %1006 = vtanh.f32 %v329_v60  ;;  %v392_v18 = vrot.slane %v329_v60, 6 }
 0x4e3   :  { %v1007_v61 = vpop.eup %1006 }
 0x4e4   :  { %332 = vrot.lane.b32.xlu0 %v1007_v61, %s1131_s0 }
 0x556   :  { %v333_v62 = vpop.permute.xlu0 %332 }
 0x557   :  { %v1278_v63 = vmul.f32 %v333_v62, %v315_v54 }
 0x559   :  { %v336_v1 = vpack.c.bf16 %v1278_v63, %v1278_v63 }
 0x55b   :  { %v338_v2 = vrot.slane %v336_v1, 1 }
 0x55d   :  { %339 = vrot.lane.b32.xlu1 %v338_v2, %s1137_s3 }
 0x5cf   :  { %v340_v3 = vpop.permute.xlu1 %339 }
 0x5d0   :  { %937 = vmatmul.mubr.msk.bf16.vlgmr.msra.gmra.mrb[4].mxu1 %vm194_vm6, %v340_v3 }
 0x5d1   :  { %949 = vmatpush3.bf16.msra.mxu1 %v1213_v4  ;;  %952 = vmatprep.mubr.msk.bf16.mxu1 %vm1134_vm0, %v1133_v0 }
 0x5d2   :  { %950 = vmatprep.subr.bf16.mxu1 %v1133_v0 }
 0x5d5   :  { %951 = vmatpush3.bf16.msra.mxu1 %v1216_v6 }
 0x5d6   :  { %964 = vmatprep.subr.bf16.mxu1 %v1133_v0 }
 0x6a3   :  { %v378_v5 = vpop.f32.mrb[4].mxu1 }
 0x6a4   :  { %v385_v7 = vrot.slane %v378_v5, 4  ;;  %v938_v8 = vpop.f32.mrb[5].mxu1 }
 0x6a5   :  { %v381_v9 = vpop.f32.mrb[6].mxu1 }
 0x6a6   :  { %v387_v11 = vadd.f32 %v385_v7, %v1240_v23  ;;  %v939_v12 = vpop.f32.mrb[7].mxu1 }
 0x6a8   :  { %1008 = vtanh.f32 %v387_v11 }
 0x6b2   :  { %v1009_v13 = vpop.eup %1008 }
 0x6b3   :  { %v389_v14 = vmul.f32 %v1009_v13, %v1251_v31 }
 0x6b5   :  { %v390_v15 = vadd.f32 %v389_v14, %v1253_v33 }
 0x6b7   :  { %396 = vrot.lane.b32.xlu0 %v390_v15, %s1131_s0  ;;  %v394_v19 = vmul.f32 %v392_v18, %v390_v15 }
 0x729   :  { %v397_v16 = vpop.permute.xlu0 %396 }
 0x72a   :  { %v399_v17 = vmul.f32 %v397_v16, %v390_v15 }
 0x72c   :  { %401 = vrot.lane.b32.xlu1 %v399_v17, %s1137_s3 }
 0x79e   :  { %v402_v20 = vpop.permute.xlu1 %401 }
 0x79f   :  { %v404_v21 = vadd.f32 %v402_v20, %v394_v19 }
 0x7a1   :  { %1010 = vtanh.f32 %v404_v21  ;;  %v467_v45 = vrot.slane %v404_v21, 6 }
 0x7ab   :  { %v1011_v22 = vpop.eup %1010 }
 0x7ac   :  { %407 = vrot.lane.b32.xlu0 %v1011_v22, %s1131_s0 }
 0x81e   :  { %v408_v23 = vpop.permute.xlu0 %407 }
 0x81f   :  { %v1296_v24 = vmul.f32 %v408_v23, %v390_v15 }
 0x821   :  { %v411_v26 = vpack.c.bf16 %v1296_v24, %v1296_v24 }
 0x823   :  { %v413_v27 = vrot.slane %v411_v26, 2 }
 0x825   :  { %414 = vrot.lane.b32.xlu1 %v413_v27, %s1137_s3 }
 0x897   :  { %v415_v30 = vpop.permute.xlu1 %414 }
 0x898   :  { %945 = vmatmul.mubr.msk.bf16.vlgmr.msra.gmra.mrb[8].mxu0 %vm194_vm6, %v415_v30 }
 0x899   :  { %957 = vmatpush3.bf16.msra.mxu0 %v1213_v4  ;;  %960 = vmatprep.mubr.msk.bf16.mxu0 %vm1134_vm0, %v1133_v0 }
 0x89a   :  { %958 = vmatprep.subr.bf16.mxu0 %v1133_v0 }
 0x89d   :  { %959 = vmatpush3.bf16.msra.mxu0 %v1216_v6 }
 0x89e   :  { %972 = vmatprep.subr.bf16.mxu0 %v1133_v0 }
 0x96b   :  { %v453_v32 = vpop.f32.mrb[8].mxu0 }
 0x96c   :  { %v460_v34 = vrot.slane %v453_v32, 2  ;;  %v946_v35 = vpop.f32.mrb[9].mxu0 }
 0x96d   :  { %v456_v36 = vpop.f32.mrb[10].mxu0 }
 0x96e   :  { %v462_v37 = vadd.f32 %v460_v34, %v1242_v25  ;;  %v947_v38 = vpop.f32.mrb[11].mxu0 }
 0x970   :  { %1012 = vtanh.f32 %v462_v37 }
 0x97a   :  { %v1013_v39 = vpop.eup %1012 }
 0x97b   :  { %v464_v40 = vmul.f32 %v1013_v39, %v1251_v31 }
 0x97d   :  { %v465_v41 = vadd.f32 %v464_v40, %v1253_v33 }
 0x97f   :  { %471 = vrot.lane.b32.xlu0 %v465_v41, %s1131_s0  ;;  %v469_v46 = vmul.f32 %v467_v45, %v465_v41 }
 0x9f1   :  { %v472_v42 = vpop.permute.xlu0 %471 }
 0x9f2   :  { %v474_v44 = vmul.f32 %v472_v42, %v465_v41 }
 0x9f4   :  { %476 = vrot.lane.b32.xlu1 %v474_v44, %s1137_s3 }
 0xa66   :  { %v477_v47 = vpop.permute.xlu1 %476 }
 0xa67   :  { %v479_v48 = vadd.f32 %v477_v47, %v469_v46 }
 0xa69   :  { %1014 = vtanh.f32 %v479_v48  ;;  %v543_v2 = vrot.slane %v479_v48, 6 }
 0xa73   :  { %v1015_v49 = vpop.eup %1014 }
 0xa74   :  { %482 = vrot.lane.b32.xlu0 %v1015_v49, %s1131_s0 }
 0xae6   :  { %v483_v25 = vpop.permute.xlu0 %482 }
 0xae7   :  { %v1314_v50 = vmul.f32 %v483_v25, %v465_v41 }
 0xae9   :  { %v490_v51 = vpack.c.bf16 %v1314_v50, %v1314_v50 }
 0xaeb   :  { %v492_v52 = vrot.slane %v490_v51, 3 }
 0xaed   :  { %493 = vrot.lane.b32.xlu1 %v492_v52, %s1137_s3 }
 0xb5f   :  { %v494_v53 = vpop.permute.xlu1 %493 }
 0xb60   :  { %953 = vmatmul.mubr.msk.bf16.vlgmr.msra.gmra.mrb[8].mxu1 %vm194_vm6, %v494_v53 }
 0xb61   :  { %965 = vmatpush3.bf16.msra.mxu1 %v1213_v4  ;;  %968 = vmatprep.mubr.msk.bf16.mxu1 %vm1134_vm0, %v1133_v0 }
 0xb62   :  { %966 = vmatprep.subr.bf16.mxu1 %v1133_v0 }
 0xb65   :  { %967 = vmatpush3.bf16.msra.mxu1 %v1216_v6 }
 0xc33   :  { %v532_v54 = vpop.f32.mrb[8].mxu1 }
 0xc34   :  { %v538_v55 = vadd.f32 %v532_v54, %v1245_v28  ;;  %v954_v56 = vpop.f32.mrb[9].mxu1 }
 0xc35   :  { %v535_v57 = vpop.f32.mrb[10].mxu1 }
 0xc36   :  { %1016 = vtanh.f32 %v538_v55  ;;  %v955_v58 = vpop.f32.mrb[11].mxu1 }
 0xc40   :  { %v1017_v59 = vpop.eup %1016 }
 0xc41   :  { %v540_v60 = vmul.f32 %v1017_v59, %v1251_v31 }
 0xc43   :  { %v541_v61 = vadd.f32 %v540_v60, %v1253_v33 }
 0xc45   :  { %547 = vrot.lane.b32.xlu0 %v541_v61, %s1131_s0  ;;  %v545_v3 = vmul.f32 %v543_v2, %v541_v61 }
 0xcb7   :  { %v548_v62 = vpop.permute.xlu0 %547 }
 0xcb8   :  { %v550_v1 = vmul.f32 %v548_v62, %v541_v61 }
 0xcba   :  { %552 = vrot.lane.b32.xlu1 %v550_v1, %s1137_s3 }
 0xd2c   :  { %v553_v5 = vpop.permute.xlu1 %552 }
 0xd2d   :  { %v555_v7 = vadd.f32 %v553_v5, %v545_v3 }
 0xd2f   :  { %1018 = vtanh.f32 %v555_v7 }
 0xd39   :  { %v1019_v8 = vpop.eup %1018 }
 0xd3a   :  { %558 = vrot.lane.b32.xlu0 %v1019_v8, %s1131_s0 }
 0xdac   :  { %v559_v9 = vpop.permute.xlu0 %558 }
 0xdad   :  { %v1331_v11 = vmul.f32 %v559_v9, %v541_v61 }
 0xdaf   :  { %v565_v12 = vpack.c.bf16 %v1331_v11, %v1331_v11 }
 0xdb1   :  { %567 = vrot.lane.b32.xlu1 %v565_v12, %s1137_s3  ;;  %v802_v12 = vrot.slane %v1278_v63, 2 }
 0xe23   :  { %v568_v13 = vpop.permute.xlu1 %567 }
 0xe24   :  { %961 = vmatmul.mubr.msk.bf16.vlgmr.msra.gmra.mrb[12].mxu0 %vm194_vm6, %v568_v13 }
 0xe25   :  { %973 = vmatpush3.bf16.msra.mxu0 %v1213_v4  ;;  %976 = vmatprep.mubr.msk.bf16.mxu0 %vm1134_vm0, %v1133_v0 }
 0xe26   :  { %974 = vmatprep.subr.bf16.mxu0 %v1133_v0  ;;  %v620_v0 = vrot.slane %v555_v7, 6 }
 0xe29   :  { %975 = vmatpush3.bf16.msra.mxu0 %v1216_v6 }
 0xef7   :  { %v606_v14 = vpop.f32.mrb[12].mxu0 }
 0xef8   :  { %v613_v15 = vrot.slane %v606_v14, 6  ;;  %v962_v16 = vpop.f32.mrb[13].mxu0 }
 0xef9   :  { %v609_v17 = vpop.f32.mrb[14].mxu0 }
 0xefa   :  { %v615_v18 = vadd.f32 %v613_v15, %v1247_v29  ;;  %v963_v19 = vpop.f32.mrb[15].mxu0 }
 0xefc   :  { %1020 = vtanh.f32 %v615_v18 }
 0xf06   :  { %v1021_v20 = vpop.eup %1020 }
 0xf07   :  { %v617_v21 = vmul.f32 %v1021_v20, %v1251_v31 }
 0xf09   :  { %v618_v4 = vadd.f32 %v617_v21, %v1253_v33 }
 0xf0b   :  { %624 = vrot.lane.b32.xlu0 %v618_v4, %s1131_s0  ;;  %v622_v6 = vmul.f32 %v620_v0, %v618_v4 }
 0xf7d   :  { %v625_v22 = vpop.permute.xlu0 %624 }
 0xf7e   :  { %v627_v23 = vmul.f32 %v625_v22, %v618_v4 }
 0xf80   :  { %629 = vrot.lane.b32.xlu1 %v627_v23, %s1137_s3 }
 0xff2   :  { %v630_v26 = vpop.permute.xlu1 %629 }
 0xff3   :  { %v632_v27 = vadd.f32 %v630_v26, %v622_v6 }
 0xff5   :  { %1022 = vtanh.f32 %v632_v27  ;;  %v695_v25 = vrot.slane %v632_v27, 6 }
 0xfff   :  { %v1023_v30 = vpop.eup %1022 }
0x1000   :  { %635 = vrot.lane.b32.xlu0 %v1023_v30, %s1131_s0 }
0x1072   :  { %v636_v32 = vpop.permute.xlu0 %635 }
0x1073   :  { %v1348_v34 = vmul.f32 %v636_v32, %v618_v4 }
0x1075   :  { %v639_v35 = vpack.c.bf16 %v1348_v34, %v1348_v34  ;;  %v820_v63 = vrot.slane %v1348_v34, 2 }
0x1077   :  { %v641_v36 = vrot.slane %v639_v35, 1 }
0x1079   :  { %642 = vrot.lane.b32.xlu1 %v641_v36, %s1137_s3 }
0x10eb   :  { %v643_v37 = vpop.permute.xlu1 %642 }
0x10ec   :  { %969 = vmatmul.mubr.msk.bf16.vlgmr.msra.gmra.mrb[12].mxu1 %vm194_vm6, %v643_v37 }
0x11bf   :  { %v681_v38 = vpop.f32.mrb[12].mxu1 }
0x11c0   :  { %v688_v39 = vrot.slane %v681_v38, 4  ;;  %v970_v40 = vpop.f32.mrb[13].mxu1 }
0x11c1   :  { %v684_v41 = vpop.f32.mrb[14].mxu1 }
0x11c2   :  { %v690_v42 = vadd.f32 %v688_v39, %v1245_v28  ;;  %v971_v44 = vpop.f32.mrb[15].mxu1 }
0x11c4   :  { %1024 = vtanh.f32 %v690_v42 }
0x11ce   :  { %v1025_v45 = vpop.eup %1024 }
0x11cf   :  { %v692_v46 = vmul.f32 %v1025_v45, %v1251_v31 }
0x11d1   :  { %v693_v47 = vadd.f32 %v692_v46, %v1253_v33 }
0x11d3   :  { %699 = vrot.lane.b32.xlu0 %v693_v47, %s1131_s0  ;;  %v697_v51 = vmul.f32 %v695_v25, %v693_v47 }
0x1245   :  { %v700_v48 = vpop.permute.xlu0 %699 }
0x1246   :  { %v702_v49 = vmul.f32 %v700_v48, %v693_v47 }
0x1248   :  { %704 = vrot.lane.b32.xlu1 %v702_v49, %s1137_s3 }
0x12ba   :  { %v705_v52 = vpop.permute.xlu1 %704 }
0x12bb   :  { %v707_v53 = vadd.f32 %v705_v52, %v697_v51 }
0x12bd   :  { %1026 = vtanh.f32 %v707_v53 }
0x12c7   :  { %v1027_v54 = vpop.eup %1026 }
0x12c8   :  { %710 = vrot.lane.b32.xlu0 %v1027_v54, %s1131_s0 }
0x133a   :  { %v711_v28 = vpop.permute.xlu0 %710 }
0x133b   :  { %v713_v55 = vmul.f32 %v711_v28, %v693_v47 }
0x133d   :  { %v714_v56 = vpack.c.bf16 %v713_v55, %v713_v55 }
0x133f   :  { %v716_v57 = vrot.slane %v714_v56, 2 }
0x1341   :  { %717 = vrot.lane.b32.xlu1 %v716_v57, %s1137_s3 }
0x13b3   :  { %v718_v58 = vpop.permute.xlu1 %717 }
0x13b4   :  { %977 = vmatmul.mubr.msk.bf16.vlgmr.msra.gmra.mrb[16].mxu0 %vm194_vm6, %v718_v58 }
0x1487   :  { %v756_v59 = vpop.f32.mrb[16].mxu0 }
0x1488   :  { %v763_v60 = vrot.slane %v756_v59, 2  ;;  %v978_v61 = vpop.f32.mrb[17].mxu0 }
0x1489   :  { %v759_v62 = vpop.f32.mrb[18].mxu0 }
0x148a   :  { %v765_v1 = vadd.f32 %v763_v60, %v1247_v29  ;;  %v979_v2 = vpop.f32.mrb[19].mxu0  ;;  %v815_v29 = vrot.slane %v1296_v24, 4 }
0x148c   :  { %1028 = vtanh.f32 %v765_v1 }
0x1496   :  { %v1029_v3 = vpop.eup %1028 }
0x1497   :  { %v767_v5 = vmul.f32 %v1029_v3, %v1251_v31  ;;  %v828_v31 = vrot.slane %v1314_v50, 6 }
0x1499   :  { %v768_v7 = vadd.f32 %v767_v5, %v1253_v33  ;;  %v770_v33 = vrot.slane %v707_v53, 6 }
0x149b   :  { %774 = vrot.lane.b32.xlu0 %v768_v7, %s1131_s0  ;;  %v772_v13 = vmul.f32 %v770_v33, %v768_v7 }
0x150d   :  { %v775_v8 = vpop.permute.xlu0 %774 }
0x150e   :  { %v777_v9 = vmul.f32 %v775_v8, %v768_v7 }
0x1510   :  { %779 = vrot.lane.b32.xlu1 %v777_v9, %s1137_s3 }
0x1514   :  { %790 = vrot.lane.b32.xlu1 %v1260_v43, %s1137_s3  ;;  %v807_v43 = vrot.slane %v713_v55, 4 }
0x1518   :  { %803 = vrot.lane.b32.xlu1 %v802_v12, %s1137_s3 }
0x151c   :  { %816 = vrot.lane.b32.xlu1 %v815_v29, %s1137_s3 }
0x1520   :  { %829 = vrot.lane.b32.xlu1 %v828_v31, %s1137_s3 }
0x1582   :  { %v780_v14 = vpop.permute.xlu1 %779 }
0x1583   :  { %v782_v15 = vadd.f32 %v780_v14, %v772_v13 }
0x1585   :  { %1030 = vtanh.f32 %v782_v15 }
0x1586   :  { %v791_v24 = vpop.permute.xlu1 %790 }
0x158a   :  { %v804_v18 = vpop.permute.xlu1 %803 }
0x158e   :  { %v817_v22 = vpop.permute.xlu1 %816 }
0x158f   :  { %v1031_v16 = vpop.eup %1030 }
0x1590   :  { %785 = vrot.lane.b32.xlu0 %v1031_v16, %s1131_s0 }
0x1592   :  { %v830_v32 = vpop.permute.xlu1 %829 }
0x1594   :  { %808 = vrot.lane.b32.xlu0 %v807_v43, %s1137_s3 }
0x1598   :  { %821 = vrot.lane.b32.xlu0 %v820_v63, %s1137_s3 }
0x1602   :  { %v786_v17 = vpop.permute.xlu0 %785 }
0x1603   :  { %v788_v50 = vmul.f32 %v786_v17, %v768_v7 }
0x1605   :  { %v794_v19 = vrot.slane %v788_v50, 6 }
0x1606   :  { %v809_v20 = vpop.permute.xlu0 %808 }
0x1607   :  { %v811_v21 = vsel %vm177_vm7, %v804_v18, %v809_v20  ;;  %v845_v4 = vsel %vm177_vm7, %v809_v20, %v804_v18  ;;  %795 = vrot.lane.b32.xlu0 %v794_v19, %s1137_s3 }
0x1608   :  { %813 = vst.msk [vmem:[#allocation8 + $0x2] sm:$0x3] %vm799_vm8, %v811_v21  ;;  %847 = vst.msk [vmem:[#allocation8 + $0xc] sm:$0x3] %vm799_vm8, %v845_v4 }
0x160a   :  { %v822_v23 = vpop.permute.xlu0 %821 }
0x160b   :  { %v824_v0 = vsel %vm177_vm7, %v817_v22, %v822_v23  ;;  %v842_v6 = vsel %vm177_vm7, %v822_v23, %v817_v22  ;;  %833 = vrot.lane.b32.xlu0 %v1331_v11, %s1137_s3 }
0x160c   :  { %826 = vst.msk [vmem:[#allocation8 + $0x4] sm:$0x3] %vm799_vm8, %v824_v0  ;;  %844 = vst.msk [vmem:[#allocation8 + $0xa] sm:$0x3] %vm799_vm8, %v842_v6 }
0x1679   :  { %v796_v26 = vpop.permute.xlu0 %795 }
0x167a   :  { %v798_v27 = vsel %vm177_vm7, %v791_v24, %v796_v26  ;;  %v848_v30 = vsel %vm177_vm7, %v796_v26, %v791_v24 }
0x167b   :  { %800 = vst.msk [vmem:[#allocation8] sm:$0x3] %vm799_vm8, %v798_v27  ;;  %850 = vst.msk [vmem:[#allocation8 + $0xe] sm:$0x3] %vm799_vm8, %v848_v30 }
0x167d   :  { %v834_v34 = vpop.permute.xlu0 %833 }
0x167e   :  { %v836_v11 = vsel %vm177_vm7, %v830_v32, %v834_v34  ;;  %v839_v35 = vsel %vm177_vm7, %v834_v34, %v830_v32 }
0x167f   :  { %838 = vst.msk [vmem:[#allocation8 + $0x6] sm:$0x3] %vm799_vm8, %v836_v11  ;;  %841 = vst.msk [vmem:[#allocation8 + $0x8] sm:$0x3] %vm799_vm8, %v839_v35 }
0x1680   :  { %1109 = shalt.err (!%p1106_p0)
}
0x1681   :  { %s1110_s7 = scalar_lea.hbm %s1425_s4, 256 }
0x1682   :  { %p1111_p1 = scmp.ne.s32.totalorder %s1425_s4, %s1110_s7  ;;  %p1114_p2 = scmp.lt.u32.totalorder %s1110_s7, %s1425_s4 }
0x1684   :  { %p1116_p3 = pnand %p1114_p2, %p1111_p1 }
0x1686   :  { %1119 = shalt.err (!%p1116_p3)
}
0x1687   :  { %s1139_s12 = smov 2  }
0x1688   :  { %862 = dma.vmem_to_hbm [thread:$0]  %s857_s29, 256, %s1425_s4, [#allocation4], %s1137_s3, %s1137_s3, %s1139_s12  }
0x1689   :  { %1124 = dma.done.wait [#allocation4], 256  }
0x168a   :  { %1125 = vsyncadd [#allocation4], 4294967040 }
0x168b   :  { %866 = vsyncpa [#allocation3], 1 }
0x168c   :  { %867 = vsyncpa [#allocation6], 1 }
0x168d   :  { %868 = vsyncpa [#allocation4], 1 }

</bundles_post_ra>
